<compile_context>
chip_gen: v6e
topology: v6e:2x2x1
jax: 0.10.0
libtpu: 0.0.40
codegen_flags: <defaults>
</compile_context>

<pallas_src>
import numpy as np
import jax
import jax.numpy as jnp
from jax import lax
from jax.experimental import pallas as pl
from jax.experimental.pallas import tpu as pltpu

LATENT_DIM = 32
BASE_SPATIAL = 2                      # module default is 8 (-> 128^3 output)
CHANNELS = (256, 128, 64, 32, 1)      # fixed by the PyTorch module


# ----------------------------------------------------------------------------
# FC (nn.Linear) kernel:  y = z @ W.T + b
# ----------------------------------------------------------------------------
def _fc_kernel(x_ref, w_ref, b_ref, o_ref):
    o_ref[...] = (jnp.dot(x_ref[...], w_ref[...],
                          preferred_element_type=jnp.float32) + b_ref[...])


def fc_forward(z, w, b, tile_n=32768):
    """PyTorch nn.Linear semantics. z:(B,L)  w:(F,L)  b:(F,) -> (B,F)."""
    B, L = z.shape
    F = w.shape[0]
    tile_n = min(tile_n, F)
    assert F % tile_n == 0
    wt = jnp.transpose(w)              # (L, F)
    b2 = b.reshape(1, F)
    return pl.pallas_call(
        _fc_kernel,
        out_shape=jax.ShapeDtypeStruct((B, F), jnp.float32),
        grid=(F // tile_n,),
        in_specs=[
            pl.BlockSpec((B, L), lambda j: (0, 0)),
            pl.BlockSpec((L, tile_n), lambda j: (0, j)),
            pl.BlockSpec((1, tile_n), lambda j: (0, j)),
        ],
        out_specs=pl.BlockSpec((B, tile_n), lambda j: (0, j)),
        compiler_params=pltpu.CompilerParams(
            dimension_semantics=("parallel",)),
    )(z, wt, b2)


# ----------------------------------------------------------------------------
# ConvTranspose3d(3, stride=2, pad=1, out_pad=1): one GEMM per step,
# all 8 taps on K, all 8 output parities packed lane-dense on N.
# ----------------------------------------------------------------------------
def _deconv_kernel(xlo_ref, xhi_ref, w_ref, b_ref, o_ref):
    # xlo/xhi: (1,1,TR,4*Cin) for input-depth offsets 0 / +1 (both lane-aligned
    # since 4*Cin is a multiple of 128 for every layer of this model).
    xk = jnp.concatenate([xlo_ref[0, 0], xhi_ref[0, 0]], axis=-1)  # (TR, 8*Cin)
    y = jnp.dot(xk, w_ref[...], preferred_element_type=jnp.float32)
    o_ref[0, 0] = y + b_ref[...]                                   # (TR, 8*Cout)


def _make_parity_weights(w):
    """(Cin, Cout, 3, 3, 3) ConvTranspose3d weight -> packed (8*Cin, 8*Cout).

    Row index  = (dd*4 + dh*2 + dw) * Cin + ci   (input offset delta, channel)
    Col index  = (pd*4 + ph*2 + pw) * Cout + co  (output parity, channel)
    For output o = 2*i + parity along a dim: parity 0 uses tap k=1 at offset 0;
    parity 1 uses tap k=2 at offset 0 and tap k=0 at offset +1.  Invalid
    (parity, offset) combinations are zero.
    """
    w = np.asarray(w)
    cin, cout = w.shape[0], w.shape[1]
    pw = np.zeros((8, 8, cin, cout), np.float32)   # (parity, delta, Cin, Cout)

    def tap(par, d):
        if par == 0:
            return 1 if d == 0 else None
        return 2 if d == 0 else 0

    for p in range(8):
        pd, ph, pww = (p >> 2) & 1, (p >> 1) & 1, p & 1
        for dlt in range(8):
            dd, dh, dw = (dlt >> 2) & 1, (dlt >> 1) & 1, dlt & 1
            kd, kh, kw = tap(pd, dd), tap(ph, dh), tap(pww, dw)
            if kd is None or kh is None or kw is None:
                continue
            pw[p, dlt] = w[:, :, kd, kh, kw]
    packed = pw.transpose(1, 2, 0, 3).reshape(8 * cin, 8 * cout)
    return jnp.asarray(packed)


def _build_shifted(x):
    """x: (B,D,H,W,C) -> (B, D+1, H*W, 4*C); channel blocks ordered (dh, dw).

    Depth shift (dd) is handled by the kernel's BlockSpec index_map, so only a
    single 4*C-wide array is materialized (not 8 copies).
    """
    B, D, H, W, C = x.shape
    xp = jnp.pad(x, ((0, 0), (0, 1), (0, 1), (0, 1), (0, 0)))
    parts = [xp[:, :, dh:dh + H, dw:dw + W, :].reshape(B, D + 1, H * W, C)
             for dh in (0, 1) for dw in (0, 1)]
    return jnp.concatenate(parts, axis=-1)


def deconv3x3s2_packed(x, w_packed, b_packed, tile_rows=2048):
    """x: (B,D,H,W,Cin) NDHWC; w_packed: (8*Cin, 8*Cout); b_packed: (8*Cout,).
    Returns parity-packed output (B, D, H*W, 8*Cout)."""
    B, D, H, W, Cin = x.shape
    Cout8 = w_packed.shape[1]
    HW = H * W
    TR = min(HW, tile_rows)
    assert HW % TR == 0
    C4 = 4 * Cin

    xcat = _build_shifted(x)                       # (B, D+1, HW, 4*Cin)

    return pl.pallas_call(
        _deconv_kernel,
        out_shape=jax.ShapeDtypeStruct((B, D, HW, Cout8), jnp.float32),
        grid=(B, D, HW // TR),
        in_specs=[
            pl.BlockSpec((1, 1, TR, C4), lambda b, d, r: (b, d, r, 0)),
            pl.BlockSpec((1, 1, TR, C4), lambda b, d, r: (b, d + 1, r, 0)),
            pl.BlockSpec((8 * Cin, Cout8), lambda b, d, r: (0, 0)),
            pl.BlockSpec((1, Cout8), lambda b, d, r: (0, 0)),
        ],
        out_specs=pl.BlockSpec((1, 1, TR, Cout8), lambda b, d, r: (b, d, r, 0)),
        compiler_params=pltpu.CompilerParams(
            dimension_semantics=("parallel", "parallel", "parallel"),
            vmem_limit_bytes=48 * 1024 * 1024),
    )(xcat, xcat, w_packed, b_packed.reshape(1, Cout8))


def interleave_parities(yp, H, W, cout):
    """(B, D, H*W, 8*cout) parity-packed -> (B, 2D, 2H, 2W, cout)."""
    B, D = yp.shape[0], yp.shape[1]
    y = yp.reshape(B, D, H, W, 2, 2, 2, cout)
    y = y.transpose(0, 1, 4, 2, 5, 3, 6, 7)
    return y.reshape(B, 2 * D, 2 * H, 2 * W, cout)


def bn_scale_shift(yp, cout, gamma, beta, eps=1e-5):
    """Training-mode BatchNorm3d statistics (biased var, as torch) computed in
    one fused reduction pass over the parity-packed deconv output."""
    # TODO(synk): running-mean/var (momentum) buffer updates are training
    # bookkeeping with no effect on the forward output; omitted.
    n = yp.size // cout
    s1 = jnp.sum(yp, axis=(0, 1, 2)).reshape(8, cout).sum(axis=0)
    s2 = jnp.sum(jnp.square(yp), axis=(0, 1, 2)).reshape(8, cout).sum(axis=0)
    mean = s1 / n
    var = jnp.maximum(s2 / n - mean * mean, 0.0)
    scale = gamma * lax.rsqrt(var + eps)
    shift = beta - mean * scale
    return scale, shift


# ----------------------------------------------------------------------------
# Parameter init (deterministic, shapes from Decoder.__init__) and forward
# ----------------------------------------------------------------------------
def init_decoder_params(key, latent_dim=LATENT_DIM, base=BASE_SPATIAL):
    ks = jax.random.split(key, 10)
    F = CHANNELS[0] * base ** 3

    def u(k, shape, fan_in):
        bound = 1.0 / np.sqrt(fan_in)
        return jax.random.uniform(k, shape, jnp.float32, -bound, bound)

    p = {}
    p["fc_w"] = u(ks[0], (F, latent_dim), latent_dim)
    p["fc_b"] = u(ks[1], (F,), latent_dim)
    for i in range(1, 5):
        cin, cout = CHANNELS[i - 1], CHANNELS[i]
        fan = cin * 27
        p[f"w{i}"] = u(ks[2 * i], (cin, cout, 3, 3, 3), fan)
        p[f"b{i}"] = u(ks[2 * i + 1], (cout,), fan)
    for i in (1, 2, 3):
        c = CHANNELS[i]
        p[f"gamma{i}"] = jnp.ones((c,), jnp.float32)
        p[f"beta{i}"] = jnp.zeros((c,), jnp.float32)
    return p


def prepare_kernel_params(p):
    kp = dict(p)
    for i in (1, 2, 3, 4):
        kp[f"wp{i}"] = _make_parity_weights(p[f"w{i}"])   # (8*Cin, 8*Cout)
        kp[f"bp{i}"] = jnp.tile(p[f"b{i}"], 8)            # (8*Cout,)
    return kp


def decoder_forward(params, z, base=BASE_SPATIAL):
    # TODO(synk): bf16 activations/weights (f32 accumulate) would roughly
    # double MXU throughput on v6e/v7x; kept f32 here for tight validation.
    B = z.shape[0]
    c0 = CHANNELS[0]
    h = fc_forward(z, params["fc_w"], params["fc_b"])            # (B, c0*base^3)
    x = jnp.transpose(h.reshape(B, c0, base, base, base),
                      (0, 2, 3, 4, 1))                           # NDHWC
    for i in (1, 2, 3):
        H, W = x.shape[2], x.shape[3]
        cout = CHANNELS[i]
        yp = deconv3x3s2_packed(x, params[f"wp{i}"], params[f"bp{i}"])
        scale, shift = bn_scale_shift(yp, cout,
                                      params[f"gamma{i}"], params[f"beta{i}"])
        y = interleave_parities(yp, H, W, cout)
        # BN apply + ReLU: fused by XLA into the next layer's shifted-input
        # build (no standalone elementwise HBM pass).
        x = jnp.maximum(y * scale + shift, 0.0)
    H, W = x.shape[2], x.shape[3]
    yp = deconv3x3s2_packed(x, params["wp4"], params["bp4"])
    y = interleave_parities(yp, H, W, CHANNELS[4])               # (B,2D,2H,2W,1)
    return jnp.transpose(y, (0, 4, 1, 2, 3))                     # NCDHW


# ----------------------------------------------------------------------------
# Pure-XLA reference (validation only)
# ----------------------------------------------------------------------------
def _reference_deconv(x_ndhwc, w, b):
    wf = jnp.transpose(jnp.flip(w, (2, 3, 4)), (2, 3, 4, 0, 1))   # DHWIO
    y = lax.conv_general_dilated(
        x_ndhwc, wf, window_strides=(1, 1, 1),
        padding=((1, 2), (1, 2), (1, 2)), lhs_dilation=(2, 2, 2),
        dimension_numbers=("NDHWC", "DHWIO", "NDHWC"),
        precision=lax.Precision.HIGHEST)
    return y + b


def reference_forward(params, z, base=BASE_SPATIAL, eps=1e-5):
    B = z.shape[0]
    h = jnp.dot(z, params["fc_w"].T,
                precision=lax.Precision.HIGHEST) + params["fc_b"]
    x = jnp.transpose(h.reshape(B, CHANNELS[0], base, base, base),
                      (0, 2, 3, 4, 1))
    for i in (1, 2, 3):
        x = _reference_deconv(x, params[f"w{i}"], params[f"b{i}"])
        mean = jnp.mean(x, axis=(0, 1, 2, 3))
        var = jnp.mean(jnp.square(x - mean), axis=(0, 1, 2, 3))
        x = (x - mean) * lax.rsqrt(var + eps) * params[f"gamma{i}"] \
            + params[f"beta{i}"]
        x = jnp.maximum(x, 0.0)
    x = _reference_deconv(x, params["w4"], params["b4"])
    return jnp.transpose(x, (0, 4, 1, 2, 3))


if __name__ == "__main__":
    key = jax.random.PRNGKey(0)
    k_z, k_p = jax.random.split(key)
    B = 2
    z = jax.random.normal(k_z, (B, LATENT_DIM), jnp.float32)
    params = prepare_kernel_params(init_decoder_params(k_p))

    # 1) Layer-1 Pallas transposed conv vs XLA reference (tight f32 tolerance).
    h = fc_forward(z, params["fc_w"], params["fc_b"])
    x0 = jnp.transpose(
        h.reshape(B, CHANNELS[0], BASE_SPATIAL, BASE_SPATIAL, BASE_SPATIAL),
        (0, 2, 3, 4, 1))
    y1 = interleave_parities(
        deconv3x3s2_packed(x0, params["wp1"], params["bp1"]),
        BASE_SPATIAL, BASE_SPATIAL, CHANNELS[1])
    y1_ref = _reference_deconv(x0, params["w1"], params["b1"])
    np.testing.assert_allclose(np.asarray(y1), np.asarray(y1_ref),
                               rtol=1e-4, atol=1e-5)

    # 2) Full decoder forward (Pallas) vs pure-XLA reference.
    out = jax.block_until_ready(jax.jit(decoder_forward)(params, z))
    out_ref = reference_forward(params, z)
    np.testing.assert_allclose(np.asarray(out), np.asarray(out_ref),
                               rtol=1e-3, atol=1e-4)

    S = BASE_SPATIAL * 16
    assert out.shape == (B, 1, S, S, S) and out.dtype == jnp.float32
    print("KERNEL_OK")
</pallas_src>

<mosaic_0001>
module attributes {stable_mosaic.version = 11 : i64} {
  func.func @_fc_kernel(%arg0: i32, %arg1: memref<2x32xf32, #tpu.memory_space<vmem>>, %arg2: memref<32x2048xf32, #tpu.memory_space<vmem>>, %arg3: memref<1x2048xf32, #tpu.memory_space<vmem>>, %arg4: memref<2x2048xf32, #tpu.memory_space<vmem>>) attributes {dimension_semantics = [#tpu.dimension_semantics<parallel>], iteration_bounds = array<i64: 1>, scalar_prefetch = 0 : i64, scratch_operands = 0 : i64, tpu.core_type = #tpu.core_type<tc>, window_params = [{pipeline_mode = #tpu.pipeline_mode<synchronous>, transform_indices = @transform_0, window_bounds = array<i64: 2, 32>}, {transform_indices = @transform_1, window_bounds = array<i64: 32, 2048>}, {transform_indices = @transform_2, window_bounds = array<i64: 1, 2048>}, {transform_indices = @transform_3, window_bounds = array<i64: 2, 2048>}]} {
    %c0 = arith.constant 0 : index
    %c0_0 = arith.constant 0 : index
    %0 = vector.load %arg1[%c0, %c0_0] : memref<2x32xf32, #tpu.memory_space<vmem>>, vector<2x32xf32>
    %c0_1 = arith.constant 0 : index
    %c0_2 = arith.constant 0 : index
    %1 = vector.load %arg2[%c0_1, %c0_2] : memref<32x2048xf32, #tpu.memory_space<vmem>>, vector<32x2048xf32>
    %cst = arith.constant dense<0.000000e+00> : vector<2x2048xf32>
    %2 = tpu.matmul %0, %1, %cst {dimension_numbers = #tpu.dot_dimension_numbers<[1], [0], [0], [1], [0, 0, 1, 1], [], []>} : vector<2x32xf32>, vector<32x2048xf32>, vector<2x2048xf32> -> vector<2x2048xf32>
    %c0_3 = arith.constant 0 : index
    %c0_4 = arith.constant 0 : index
    %3 = vector.load %arg3[%c0_3, %c0_4] : memref<1x2048xf32, #tpu.memory_space<vmem>>, vector<1x2048xf32>
    %4 = vector.broadcast %3 : vector<1x2048xf32> to vector<2x2048xf32>
    %5 = arith.addf %2, %4 : vector<2x2048xf32>
    %c0_5 = arith.constant 0 : index
    %c0_6 = arith.constant 0 : index
    %6 = vector.load %arg4[%c0_5, %c0_6] : memref<2x2048xf32, #tpu.memory_space<vmem>>, vector<2x2048xf32>
    tpu.vector_store %arg4[%c0_5, %c0_6], %5 {strides = array<i32>} : memref<2x2048xf32, #tpu.memory_space<vmem>>, vector<2x2048xf32>,
    return
  }
  func.func @transform_0(%arg0: i32) -> (i32, i32) {
    %c0_i32 = arith.constant 0 : i32
    %c0_i32_0 = arith.constant 0 : i32
    %c0_i32_1 = arith.constant 0 : i32
    return %c0_i32, %c0_i32_0 : i32, i32
  }
  func.func @transform_1(%arg0: i32) -> (i32, i32) {
    %c0_i32 = arith.constant 0 : i32
    %c0_i32_0 = arith.constant 0 : i32
    return %c0_i32, %arg0 : i32, i32
  }
  func.func @transform_2(%arg0: i32) -> (i32, i32) {
    %c0_i32 = arith.constant 0 : i32
    %c0_i32_0 = arith.constant 0 : i32
    return %c0_i32, %arg0 : i32, i32
  }
  func.func @transform_3(%arg0: i32) -> (i32, i32) {
    %c0_i32 = arith.constant 0 : i32
    %c0_i32_0 = arith.constant 0 : i32
    return %c0_i32, %arg0 : i32, i32
  }
}

</mosaic_0001>

<bundles_post_ra>
// kernel: tpu_custom_call.1
= control target key start
LH: loop header
LB: loop body
LE: loop exit
PB: predicated region body
PF: predicated region fallthrough
CT: control target
= control target key end

     0   :  { %8 = vsyncpa [#allocation3], 0  ;;  %s1070_s0 = inlined_call_operand.hbm [shape: f32[2,32], index: 0, kind: input, shape index: {}]   ;;  %s1071_s1 = inlined_call_operand.hbm [shape: f32[32,2048], index: 1, kind: input, shape index: {}]   ;;  %s1072_s2 = inlined_call_operand.hbm [shape: f32[1,2048], index: 2, kind: input, shape index: {}]   ;;  %s1073_s3 = inlined_call_operand.hbm [shape: f32[2,2048], index: 3, kind: output, shape index: {}]  }
   0x1   :  { %9 = vsyncpa [#allocation6], 0 }
   0x2   :  { %10 = vsyncpa [#allocation4], 0  ;;  %s983_s12 = smov [#allocation5]  }
   0x3   :  { %s26_s13 = sshll.u32 %s983_s12, 4  ;;  %s27_s13 = int_to_ptr.vmem [resolvable:$true] %s26_s13 }
   0x4   :  { %s905_s14 = scalar_lea.vmem %s27_s13, 8192  ;;  %p910_p1 = scmp.lt.s32.totalorder %s27_s13, %s27_s13 }
   0x5   :  { %p906_p0 = scmp.ne.s32.totalorder %s27_s13, %s905_s14  ;;  %p911_p2 = scmp.lt.s32.totalorder %s905_s14, %s905_s14 }
   0x7   :  { %p912_p3 = por %p911_p2, %p910_p1 }
   0x9   :  { %p913_p4 = pnand %p912_p3, %p906_p0 }
   0xb   :  { %916 = shalt.err (!%p913_p4)
}
   0xc   :  { %s984_s15 = smov 2048   ;;  %s985_s16 = smov 128  }
   0xd   :  { %32 = dma.hbm_to_vmem [thread:$0]  %s1071_s1, 8192, %s27_s13, [#allocation6], %s984_s15, %s984_s15, %s985_s16  }
   0xe   :  { %s986_s19 = smov [#allocation2]   ;;  %s987_s21 = smov [#allocation7]  }
   0xf   :  { %s17_s20 = sshll.u32 %s986_s19, 4  ;;  %s39_s22 = sshll.u32 %s987_s21, 4  ;;  %s18_s20 = int_to_ptr.vmem [resolvable:$true] %s17_s20  ;;  %s40_s22 = int_to_ptr.vmem [resolvable:$true] %s39_s22 }
  0x10   :  { %s925_s23 = scalar_lea.vmem %s18_s20, 32  ;;  %p930_p6 = scmp.lt.s32.totalorder %s18_s20, %s18_s20 }
  0x11   :  { %p926_p5 = scmp.ne.s32.totalorder %s18_s20, %s925_s23  ;;  %p931_p7 = scmp.lt.s32.totalorder %s925_s23, %s925_s23 }
  0x13   :  { %p932_p8 = por %p931_p7, %p930_p6 }
  0x15   :  { %p933_p9 = pnand %p932_p8, %p926_p5 }
  0x17   :  { %936 = shalt.err (!%p933_p9)
}
  0x18   :  { %20 = dma.hbm_to_vmem [thread:$0]  %s1070_s0, 32, %s18_s20, [#allocation3]  }
  0x19   :  { %s945_s26 = scalar_lea.vmem %s40_s22, 256  ;;  %p950_p11 = scmp.lt.s32.totalorder %s40_s22, %s40_s22 }
  0x1a   :  { %p946_p10 = scmp.ne.s32.totalorder %s40_s22, %s945_s26  ;;  %p951_p12 = scmp.lt.s32.totalorder %s945_s26, %s945_s26 }
  0x1c   :  { %p952_p13 = por %p951_p12, %p950_p11 }
  0x1e   :  { %p953_p0 = pnand %p952_p13, %p946_p10 }
  0x20   :  { %956 = shalt.err (!%p953_p0)
}
  0x21   :  { %42 = dma.hbm_to_vmem [thread:$0]  %s1072_s2, 256, %s40_s22, [#allocation6]  }
  0x22   :  { %977 = dma.done.wait [#allocation3], 32  }
  0x23   :  { %978 = vsyncadd [#allocation3], 4294967264 }
  0x24   :  { %979 = dma.done.wait [#allocation6], 8448  }
  0x25   :  { %980 = vsyncadd [#allocation6], 4294958848  ;;  %v988_v0 = vmov 0.0   ;;  %v102_v1 = vld [vmem:[#allocation5 + $0x188] sm:$0xff]  ;;  %v104_v2 = vld [vmem:[#allocation5 + $0x198] sm:$0xff]  ;;  %vm201_vm0 = vcmask 261120  }
  0x26   :  { %269 = vmatprep.mubr.f32.mxu0 %v988_v0  ;;  %340 = vmatprep.mubr.f32.mxu1 %v988_v0  ;;  %v101_v3 = vld [vmem:[#allocation5 + $0x180] sm:$0xff]  ;;  %v103_v4 = vld [vmem:[#allocation5 + $0x190] sm:$0xff]  ;;  %v86_v5 = vld [vmem:[#allocation5 + $0x108] sm:$0xff]  ;;  %s990_s0 = smov [#allocation8]  }
  0x27   :  { %229 = vmatprep.subr.mxu0 %v102_v1  ;;  %300 = vmatprep.subr.mxu1 %v104_v2  ;;  %v88_v6 = vld [vmem:[#allocation5 + $0x118] sm:$0xff]  ;;  %v85_v7 = vld [vmem:[#allocation5 + $0x100] sm:$0xff]  ;;  %v87_v8 = vld [vmem:[#allocation5 + $0x110] sm:$0xff]  ;;  %s871_s2 = sshll.u32 %s990_s0, 4  ;;  %s872_s2 = int_to_ptr.vmem [resolvable:$true] %s871_s2 }
  0x28   :  { %230 = vmatpush1.msra.mxu0 %v101_v3  ;;  %301 = vmatpush1.msra.mxu1 %v103_v4  ;;  %v70_v9 = vld [vmem:[#allocation5 + $0x88] sm:$0xff]  ;;  %v72_v10 = vld [vmem:[#allocation5 + $0x98] sm:$0xff]  ;;  %v69_v11 = vld [vmem:[#allocation5 + $0x80] sm:$0xff]  ;;  %v121_v3 = vlaneseq  ;;  %s957_s28 = scalar_lea.vmem %s872_s2, 512  ;;  %p962_p2 = scmp.lt.s32.totalorder %s872_s2, %s872_s2 }
  0x29   :  { %231 = vmatprep.subr.mxu0 %v86_v5  ;;  %302 = vmatprep.subr.mxu1 %v88_v6  ;;  %v71_v12 = vld [vmem:[#allocation5 + $0x90] sm:$0xff]  ;;  %v54_v13 = vld [vmem:[#allocation5 + $0x8] sm:$0xff]  ;;  %v56_v14 = vld [vmem:[#allocation5 + $0x18] sm:$0xff]  ;;  %p958_p1 = scmp.ne.s32.totalorder %s872_s2, %s957_s28  ;;  %p963_p3 = scmp.lt.s32.totalorder %s957_s28, %s957_s28 }
  0x2a   :  { %232 = vmatpush1.msra.mxu0 %v85_v7  ;;  %303 = vmatpush1.msra.mxu1 %v87_v8  ;;  %v53_v15 = vld [vmem:[#allocation5] sm:$0xff]  ;;  %v55_v16 = vld [vmem:[#allocation5 + $0x10] sm:$0xff]  ;;  %v1022_v17 = vld [vmem:[#allocation2] sm:$0x3]  ;;  %v1046_v4 = vshrl.u32 %v121_v3, 7 }
  0x2b   :  { %233 = vmatprep.subr.mxu0 %v70_v9  ;;  %304 = vmatprep.subr.mxu1 %v72_v10  ;;  %v106_v18 = vld [vmem:[#allocation5 + $0x1a8] sm:$0xff]  ;;  %v108_v19 = vld [vmem:[#allocation5 + $0x1b8] sm:$0xff]  ;;  %v105_v20 = vld [vmem:[#allocation5 + $0x1a0] sm:$0xff]  ;;  %v989_v8 = vmov 1983009808   ;;  %p964_p4 = por %p963_p3, %p962_p2 }
  0x2c   :  { %234 = vmatpush1.msra.mxu0 %v69_v11  ;;  %305 = vmatpush1.msra.mxu1 %v71_v12  ;;  %v107_v21 = vld [vmem:[#allocation5 + $0x1b0] sm:$0xff]  ;;  %v90_v22 = vld [vmem:[#allocation5 + $0x128] sm:$0xff]  ;;  %v92_v23 = vld [vmem:[#allocation5 + $0x138] sm:$0xff]  ;;  %v123_v5 = vsub.s32 0, %v1046_v4  ;;  %v131_v6 = vsub.s32 2, %v1046_v4  ;;  %v792_v9 = vunpack.c.l.s4 %v989_v8  ;;  %v127_v10 = vsub.s32 1, %v1046_v4 }
  0x2d   :  { %235 = vmatprep.subr.mxu0 %v54_v13  ;;  %306 = vmatprep.subr.mxu1 %v56_v14  ;;  %v89_v24 = vld [vmem:[#allocation5 + $0x120] sm:$0xff]  ;;  %v91_v25 = vld [vmem:[#allocation5 + $0x130] sm:$0xff]  ;;  %v74_v26 = vld [vmem:[#allocation5 + $0xa8] sm:$0xff]  ;;  %p965_p5 = pnand %p964_p4, %p958_p1 }
  0x2e   :  { %236 = vmatpush1.msra.mxu0 %v53_v15  ;;  %307 = vmatpush1.msra.mxu1 %v55_v16  ;;  %v76_v27 = vld [vmem:[#allocation5 + $0xb8] sm:$0xff]  ;;  %v73_v28 = vld [vmem:[#allocation5 + $0xa0] sm:$0xff]  ;;  %v75_v29 = vld [vmem:[#allocation5 + $0xb0] sm:$0xff]  ;;  %v793_v13 = vunpack.c.0.s8 %v792_v9 }
  0x2f   :  { %881 = vmatmul.mubr.msk.f32.vlgmr.msra.gmra.mxu0 %vm201_vm0, %v1022_v17  ;;  %882 = vmatmul.mubr.msk.f32.vlgmr.msra.gmra.mxu1 %vm201_vm0, %v1022_v17  ;;  %v58_v30 = vld [vmem:[#allocation5 + $0x28] sm:$0xff]  ;;  %v60_v31 = vld [vmem:[#allocation5 + $0x38] sm:$0xff]  ;;  %v57_v32 = vld [vmem:[#allocation5 + $0x20] sm:$0xff] }
  0x30   :  { %371 = vmatprep.subr.mxu0 %v106_v18  ;;  %442 = vmatprep.subr.mxu1 %v108_v19  ;;  %v59_v33 = vld [vmem:[#allocation5 + $0x30] sm:$0xff]  ;;  %v110_v34 = vld [vmem:[#allocation5 + $0x1c8] sm:$0xff]  ;;  %v112_v35 = vld [vmem:[#allocation5 + $0x1d8] sm:$0xff] }
  0x31   :  { %372 = vmatpush1.msra.mxu0 %v105_v20  ;;  %443 = vmatpush1.msra.mxu1 %v107_v21  ;;  %v109_v36 = vld [vmem:[#allocation5 + $0x1c0] sm:$0xff]  ;;  %v111_v37 = vld [vmem:[#allocation5 + $0x1d0] sm:$0xff]  ;;  %v94_v38 = vld [vmem:[#allocation5 + $0x148] sm:$0xff]  ;;  %v1053_v21 = vsub.s32 %v793_v13, %v1046_v4 }
  0x32   :  { %373 = vmatprep.subr.mxu0 %v90_v22  ;;  %444 = vmatprep.subr.mxu1 %v92_v23  ;;  %v96_v39 = vld [vmem:[#allocation5 + $0x158] sm:$0xff]  ;;  %v93_v40 = vld [vmem:[#allocation5 + $0x140] sm:$0xff]  ;;  %v95_v41 = vld [vmem:[#allocation5 + $0x150] sm:$0xff] }
  0x33   :  { %374 = vmatpush1.msra.mxu0 %v89_v24  ;;  %445 = vmatpush1.msra.mxu1 %v91_v25  ;;  %v78_v42 = vld [vmem:[#allocation5 + $0xc8] sm:$0xff]  ;;  %v80_v43 = vld [vmem:[#allocation5 + $0xd8] sm:$0xff]  ;;  %v77_v44 = vld [vmem:[#allocation5 + $0xc0] sm:$0xff]  ;;  %v139_v25 = vsub.s32 4, %v1046_v4 }
  0x34   :  { %375 = vmatprep.subr.mxu0 %v74_v26  ;;  %446 = vmatprep.subr.mxu1 %v76_v27  ;;  %v79_v45 = vld [vmem:[#allocation5 + $0xd0] sm:$0xff]  ;;  %v62_v46 = vld [vmem:[#allocation5 + $0x48] sm:$0xff]  ;;  %v64_v47 = vld [vmem:[#allocation5 + $0x58] sm:$0xff]  ;;  %v147_v26 = vsub.s32 6, %v1046_v4 }
  0x35   :  { %376 = vmatpush1.msra.mxu0 %v73_v28  ;;  %447 = vmatpush1.msra.mxu1 %v75_v29  ;;  %v61_v48 = vld [vmem:[#allocation5 + $0x40] sm:$0xff]  ;;  %v63_v49 = vld [vmem:[#allocation5 + $0x50] sm:$0xff]  ;;  %v114_v50 = vld [vmem:[#allocation5 + $0x1e8] sm:$0xff]  ;;  %v143_v29 = vsub.s32 5, %v1046_v4 }
  0x36   :  { %377 = vmatprep.subr.mxu0 %v58_v30  ;;  %448 = vmatprep.subr.mxu1 %v60_v31  ;;  %v116_v51 = vld [vmem:[#allocation5 + $0x1f8] sm:$0xff]  ;;  %v113_v52 = vld [vmem:[#allocation5 + $0x1e0] sm:$0xff]  ;;  %v115_v53 = vld [vmem:[#allocation5 + $0x1f0] sm:$0xff]  ;;  %v151_v30 = vsub.s32 7, %v1046_v4 }
  0x37   :  { %378 = vmatpush1.msra.mxu0 %v57_v32  ;;  %411 = vmatprep.mubr.f32.mxu0 %v988_v0  ;;  %v98_v54 = vld [vmem:[#allocation5 + $0x168] sm:$0xff]  ;;  %v100_v55 = vld [vmem:[#allocation5 + $0x178] sm:$0xff]  ;;  %v97_v56 = vld [vmem:[#allocation5 + $0x160] sm:$0xff] }
  0x38   :  { %449 = vmatpush1.msra.mxu1 %v59_v33  ;;  %482 = vmatprep.mubr.f32.mxu1 %v988_v0  ;;  %v99_v57 = vld [vmem:[#allocation5 + $0x170] sm:$0xff]  ;;  %v82_v58 = vld [vmem:[#allocation5 + $0xe8] sm:$0xff]  ;;  %v84_v59 = vld [vmem:[#allocation5 + $0xf8] sm:$0xff] }
  0x39   :  { %883 = vmatmul.mubr.msk.f32.vlgmr.msra.gmra.mxu0 %vm201_vm0, %v1022_v17  ;;  %884 = vmatmul.mubr.msk.f32.vlgmr.msra.gmra.mxu1 %vm201_vm0, %v1022_v17  ;;  %v81_v60 = vld [vmem:[#allocation5 + $0xe0] sm:$0xff]  ;;  %v83_v61 = vld [vmem:[#allocation5 + $0xf0] sm:$0xff]  ;;  %v66_v62 = vld [vmem:[#allocation5 + $0x68] sm:$0xff] }
  0x3a   :  { %513 = vmatprep.subr.mxu0 %v110_v34  ;;  %584 = vmatprep.subr.mxu1 %v112_v35  ;;  %v68_v63 = vld [vmem:[#allocation5 + $0x78] sm:$0xff]  ;;  %v65_v1 = vld [vmem:[#allocation5 + $0x60] sm:$0xff]  ;;  %v67_v2 = vld [vmem:[#allocation5 + $0x70] sm:$0xff] }
  0x3b   :  { %514 = vmatpush1.msra.mxu0 %v109_v36  ;;  %585 = vmatpush1.msra.mxu1 %v111_v37  ;;  %v117_v7 = vld [vmem:[#allocation7] sm:$0xff] }
  0x3c   :  { %515 = vmatprep.subr.mxu0 %v94_v38  ;;  %586 = vmatprep.subr.mxu1 %v96_v39  ;;  %v124_v11 = vrot.slane %v117_v7, %v123_v5  ;;  %v132_v12 = vrot.slane %v117_v7, %v131_v6  ;;  %v128_v14 = vrot.slane %v117_v7, %v127_v10 }
  0x3d   :  { %516 = vmatpush1.msra.mxu0 %v93_v40  ;;  %587 = vmatpush1.msra.mxu1 %v95_v41  ;;  %v140_v33 = vrot.slane %v117_v7, %v139_v25  ;;  %v148_v34 = vrot.slane %v117_v7, %v147_v26  ;;  %v144_v36 = vrot.slane %v117_v7, %v143_v29 }
  0x3e   :  { %517 = vmatprep.subr.mxu0 %v78_v42  ;;  %588 = vmatprep.subr.mxu1 %v80_v43  ;;  %v152_v37 = vrot.slane %v117_v7, %v151_v30 }
  0x3f   :  { %518 = vmatpush1.msra.mxu0 %v77_v44  ;;  %589 = vmatpush1.msra.mxu1 %v79_v45 }
  0x40   :  { %519 = vmatprep.subr.mxu0 %v62_v46  ;;  %590 = vmatprep.subr.mxu1 %v64_v47  ;;  %v118_v46 = vld [vmem:[#allocation7 + $0x8] sm:$0xff] }
  0x41   :  { %520 = vmatpush1.msra.mxu0 %v61_v48  ;;  %553 = vmatprep.mubr.f32.mxu0 %v988_v0  ;;  %v176_v8 = vrot.slane %v118_v46, %v143_v29  ;;  %v184_v9 = vrot.slane %v118_v46, %v151_v30 }
  0x42   :  { %591 = vmatpush1.msra.mxu1 %v63_v49  ;;  %624 = vmatprep.mubr.f32.mxu1 %v988_v0 }
  0x43   :  { %885 = vmatmul.mubr.msk.f32.vlgmr.msra.gmra.mxu0 %vm201_vm0, %v1022_v17  ;;  %886 = vmatmul.mubr.msk.f32.vlgmr.msra.gmra.mxu1 %vm201_vm0, %v1022_v17 }
  0x44   :  { %655 = vmatprep.subr.mxu0 %v114_v50  ;;  %726 = vmatprep.subr.mxu1 %v116_v51  ;;  %v156_v51 = vrot.slane %v118_v46, %v123_v5  ;;  %v172_v5 = vrot.slane %v118_v46, %v139_v25 }
  0x45   :  { %656 = vmatpush1.msra.mxu0 %v113_v52  ;;  %727 = vmatpush1.msra.mxu1 %v115_v53  ;;  %v164_v52 = vrot.slane %v118_v46, %v131_v6 }
  0x46   :  { %657 = vmatprep.subr.mxu0 %v98_v54  ;;  %728 = vmatprep.subr.mxu1 %v100_v55  ;;  %v160_v54 = vrot.slane %v118_v46, %v127_v10 }
  0x47   :  { %658 = vmatpush1.msra.mxu0 %v97_v56  ;;  %729 = vmatpush1.msra.mxu1 %v99_v57 }
  0x48   :  { %659 = vmatprep.subr.mxu0 %v82_v58  ;;  %730 = vmatprep.subr.mxu1 %v84_v59 }
  0x49   :  { %660 = vmatpush1.msra.mxu0 %v81_v60  ;;  %731 = vmatpush1.msra.mxu1 %v83_v61 }
  0x4a   :  { %661 = vmatprep.subr.mxu0 %v66_v62  ;;  %732 = vmatprep.subr.mxu1 %v68_v63 }
  0x4b   :  { %662 = vmatpush1.msra.mxu0 %v65_v1  ;;  %695 = vmatprep.mubr.f32.mxu0 %v988_v0 }
  0x4c   :  { %733 = vmatpush1.msra.mxu1 %v67_v2  ;;  %766 = vmatprep.mubr.f32.mxu1 %v988_v0  ;;  %v135_v0 = vsub.s32 3, %v1046_v4 }
  0x4d   :  { %887 = vmatmul.mubr.msk.f32.vlgmr.msra.gmra.mxu0 %vm201_vm0, %v1022_v17  ;;  %888 = vmatmul.mubr.msk.f32.vlgmr.msra.gmra.mxu1 %vm201_vm0, %v1022_v17 }
  0x4e   :  { %v136_v15 = vrot.slane %v117_v7, %v135_v0  ;;  %v168_v55 = vrot.slane %v118_v46, %v135_v0  ;;  %v180_v7 = vrot.slane %v118_v46, %v147_v26 }
  0xef   :  { %v271_v16 = vpop.f32.mrf.mxu0  ;;  %v342_v17 = vpop.f32.mrf.mxu1 }
  0xf0   :  { %v272_v18 = vadd.f32 %v271_v16, %v124_v11  ;;  %v343_v19 = vadd.f32 %v342_v17, %v132_v12 }
  0xf1   :  { %v273_v20 = vpop.f32.mrf.mxu0  ;;  %v344_v22 = vpop.f32.mrf.mxu1 }
  0xf2   :  { %v274_v23 = vadd.f32 %v273_v20, %v128_v14  ;;  %v345_v24 = vadd.f32 %v344_v22, %v136_v15 }
  0xf4   :  { %v789_v27 = vcombine.low %v272_v18, %v274_v23  ;;  %v790_v28 = vcombine.low %v343_v19, %v345_v24 }
  0xf6   :  { %v797_v31 = vrot.slane %v789_v27, %v1053_v21  ;;  %v804_v32 = vrot.slane %v790_v28, %v1053_v21 }
  0xf8   :  { %v805_v35 = vcombine.low %v797_v31, %v804_v32 }
  0xf9   :  { %v413_v38 = vpop.f32.mrf.mxu0  ;;  %v484_v39 = vpop.f32.mrf.mxu1 }
  0xfa   :  { %861 = vst [vmem:[#allocation8] sm:$0xff] %v805_v35  ;;  %v414_v40 = vadd.f32 %v413_v38, %v140_v33  ;;  %v485_v41 = vadd.f32 %v484_v39, %v148_v34 }
  0xfb   :  { %v415_v42 = vpop.f32.mrf.mxu0  ;;  %v486_v43 = vpop.f32.mrf.mxu1 }
  0xfc   :  { %v416_v44 = vadd.f32 %v415_v42, %v144_v36  ;;  %v487_v45 = vadd.f32 %v486_v43, %v152_v37 }
  0xfe   :  { %v806_v47 = vcombine.low %v414_v40, %v416_v44  ;;  %v807_v48 = vcombine.low %v485_v41, %v487_v45 }
 0x100   :  { %v814_v49 = vrot.slane %v806_v47, %v1053_v21  ;;  %v821_v50 = vrot.slane %v807_v48, %v1053_v21 }
 0x102   :  { %v822_v53 = vcombine.low %v814_v49, %v821_v50 }
 0x103   :  { %v555_v56 = vpop.f32.mrf.mxu0  ;;  %v626_v57 = vpop.f32.mrf.mxu1 }
 0x104   :  { %862 = vst [vmem:[#allocation8 + $0x8] sm:$0xff] %v822_v53  ;;  %v556_v58 = vadd.f32 %v555_v56, %v156_v51  ;;  %v627_v59 = vadd.f32 %v626_v57, %v164_v52 }
 0x105   :  { %v557_v60 = vpop.f32.mrf.mxu0  ;;  %v628_v61 = vpop.f32.mrf.mxu1 }
 0x106   :  { %v558_v62 = vadd.f32 %v557_v60, %v160_v54  ;;  %v629_v63 = vadd.f32 %v628_v61, %v168_v55 }
 0x108   :  { %v823_v1 = vcombine.low %v556_v58, %v558_v62  ;;  %v824_v2 = vcombine.low %v627_v59, %v629_v63 }
 0x10a   :  { %v831_v3 = vrot.slane %v823_v1, %v1053_v21  ;;  %v838_v4 = vrot.slane %v824_v2, %v1053_v21 }
 0x10c   :  { %v839_v6 = vcombine.low %v831_v3, %v838_v4 }
 0x10d   :  { %v697_v10 = vpop.f32.mrf.mxu0  ;;  %v768_v0 = vpop.f32.mrf.mxu1 }
 0x10e   :  { %863 = vst [vmem:[#allocation8 + $0x10] sm:$0xff] %v839_v6  ;;  %v698_v13 = vadd.f32 %v697_v10, %v172_v5  ;;  %v769_v14 = vadd.f32 %v768_v0, %v180_v7 }
 0x10f   :  { %v699_v11 = vpop.f32.mrf.mxu0  ;;  %v770_v12 = vpop.f32.mrf.mxu1 }
 0x110   :  { %v700_v15 = vadd.f32 %v699_v11, %v176_v8  ;;  %v771_v16 = vadd.f32 %v770_v12, %v184_v9 }
 0x112   :  { %v840_v17 = vcombine.low %v698_v13, %v700_v15  ;;  %v841_v18 = vcombine.low %v769_v14, %v771_v16 }
 0x114   :  { %v848_v19 = vrot.slane %v840_v17, %v1053_v21  ;;  %v855_v20 = vrot.slane %v841_v18, %v1053_v21 }
 0x116   :  { %v856_v22 = vcombine.low %v848_v19, %v855_v20 }
 0x118   :  { %864 = vst [vmem:[#allocation8 + $0x18] sm:$0xff] %v856_v22 }
 0x119   :  { %968 = shalt.err (!%p965_p5)
}
 0x11a   :  { %874 = dma.vmem_to_hbm [thread:$0]  %s872_s2, 512, %s1073_s3, [#allocation4]  }
 0x11b   :  { %981 = dma.done.wait [#allocation4], 512  }
 0x11c   :  { %982 = vsyncadd [#allocation4], 4294966784 }
 0x11d   :  { %878 = vsyncpa [#allocation3], 1 }
 0x11e   :  { %879 = vsyncpa [#allocation6], 1 }
 0x11f   :  { %880 = vsyncpa [#allocation4], 1 }

</bundles_post_ra>
